<compile_context>
chip_gen: v7x
topology: tpu7x:2x2x1
jax: 0.10.0
libtpu: 0.0.40
codegen_flags: <defaults>
</compile_context>

<pallas_src>
import functools

import jax
import jax.numpy as jnp
from jax import lax
from jax.experimental import pallas as pl
from jax.experimental.pallas import tpu as pltpu


# --------------------------- construction helpers ---------------------------

def _fuse_readout(Win, A, b, Wout, bout, mxu_dtype):
    """Fold the affine readout into the reservoir update.

    Win @ (Wout @ r + bout) + A @ r + b == (A + Win@Wout) @ r + (b + Win@bout)

    Returns A_eff^T (N, N) in the MXU dtype and b_eff^T (1, N) in f32, ready
    for the transposed lane-dense (M, N) kernel layout.
    """
    A_eff = jnp.asarray(A, jnp.float32) + jnp.asarray(Win, jnp.float32) @ jnp.asarray(Wout, jnp.float32)
    b_eff = jnp.asarray(b, jnp.float32) + jnp.asarray(Win, jnp.float32) @ jnp.asarray(bout, jnp.float32)
    return A_eff.T.astype(mxu_dtype), b_eff.T.astype(jnp.float32)      # (N,N), (1,N)


def _tile_m(M):
    """Pick an M-tile: multiple of 128 when possible (fills MXU rows and gives
    >1 grid block for v7x's 2 TensorCores), otherwise the full (small) M."""
    for t in (128, 256, 512):
        if M % t == 0:
            return t
    return M  # full array dim -> no (8,128) divisibility requirement


def _vmem_limit_bytes(tm, N, mxu_itemsize):
    need = (4 * tm * N * 4            # state in + out blocks, double-buffered
            + 2 * N * N * mxu_itemsize  # A_eff (double-buffered by pipeline)
            + 2 * 8 * N * 4)            # bias row (padded to 8 sublanes)
    return int(min(max(need + (4 << 20), 16 << 20), 60 << 20))


def _specs_and_grid(M, N, mxu_itemsize):
    tm = _tile_m(M)
    grid = (M // tm,)
    in_specs = [
        pl.BlockSpec((tm, N), lambda i: (i, 0)),   # state block (lane-dense)
        pl.BlockSpec((N, N), lambda i: (0, 0)),    # A_eff^T resident
        pl.BlockSpec((1, N), lambda i: (0, 0)),    # bias row resident
    ]
    out_specs = pl.BlockSpec((tm, N), lambda i: (i, 0))
    cp = pltpu.CompilerParams(
        dimension_semantics=("parallel",),
        vmem_limit_bytes=_vmem_limit_bytes(tm, N, mxu_itemsize),
    )
    return grid, in_specs, out_specs, cp


# ------------------------------- single step --------------------------------

def make_pred(Win, A, b, Wout, bout, leak, gamma, mxu_dtype=jnp.bfloat16):
    """Returns (pred_t, pred).

    pred_t(rT): transpose-free fast path, rT is (M, N), returns (M, N).
    pred(r):    original module layout, r is (N, M), returns (N, M)
                (matches Pred.forward(t, r) with the affine readout).
    """
    c_r = (leak - 1.0) / gamma
    c_t = (1.0 - leak) / gamma
    A_eff_T, b_row = _fuse_readout(Win, A, b, Wout, bout, mxu_dtype)
    mxu_itemsize = jnp.dtype(mxu_dtype).itemsize

    def pred_kernel(rT_ref, at_ref, b_ref, out_ref):
        rT = rT_ref[...]                                             # (tm, N) f32
        pre = jnp.dot(rT.astype(mxu_dtype), at_ref[...],
                      preferred_element_type=jnp.float32) + b_ref[...]
        out_ref[...] = c_r * rT + c_t * jnp.tanh(pre)                # lane-dense store

    @jax.jit
    def pred_t(rT):
        M, N = rT.shape
        grid, in_specs, out_specs, cp = _specs_and_grid(M, N, mxu_itemsize)
        return pl.pallas_call(
            pred_kernel,
            out_shape=jax.ShapeDtypeStruct((M, N), jnp.float32),
            grid=grid,
            in_specs=in_specs,
            out_specs=out_specs,
            compiler_params=cp,
        )(rT, A_eff_T, b_row)

    @jax.jit
    def pred(r):                       # compatibility wrapper, (N, M) in/out
        return pred_t(r.T).T

    return pred_t, pred


# ---------------------- weight-resident Euler rollout -----------------------

def make_rollout(Win, A, b, Wout, bout, leak, gamma, dt, n_steps,
                 mxu_dtype=jnp.bfloat16, unroll=4):
    """n_steps of forward-Euler r <- r + dt * guy(r) inside ONE pallas_call,
    weights resident in VMEM.  Euler constants folded at trace time."""
    c_r = (leak - 1.0) / gamma
    c_t = (1.0 - leak) / gamma
    alpha = 1.0 + dt * c_r
    beta = dt * c_t
    A_eff_T, b_row = _fuse_readout(Win, A, b, Wout, bout, mxu_dtype)
    mxu_itemsize = jnp.dtype(mxu_dtype).itemsize
    unroll = max(1, min(int(unroll), int(n_steps)))

    def rollout_kernel(rT_ref, at_ref, b_ref, out_ref):
        def step(_, rT):
            # Operands read from refs inside the loop (no full-tile hoist).
            pre = jnp.dot(rT.astype(mxu_dtype), at_ref[...],
                          preferred_element_type=jnp.float32) + b_ref[...]
            return alpha * rT + beta * jnp.tanh(pre)

        out_ref[...] = lax.fori_loop(0, n_steps, step, rT_ref[...],
                                     unroll=unroll)

    @jax.jit
    def rollout_t(rT):
        M, N = rT.shape
        grid, in_specs, out_specs, cp = _specs_and_grid(M, N, mxu_itemsize)
        return pl.pallas_call(
            rollout_kernel,
            out_shape=jax.ShapeDtypeStruct((M, N), jnp.float32),
            grid=grid,
            in_specs=in_specs,
            out_specs=out_specs,
            compiler_params=cp,
        )(rT, A_eff_T, b_row)

    @jax.jit
    def rollout(r):                    # compatibility wrapper, (N, M) in/out
        return rollout_t(r.T).T

    return rollout_t, rollout


# ------------------------- pure-JAX references ------------------------------

def pred_reference(r, Win, A, b, Wout, bout, leak, gamma):
    """Literal translation of Pred.forward (readout = affine map)."""
    x = Wout @ r + bout
    return (leak - 1.0) / gamma * r + (1.0 - leak) / gamma * jnp.tanh(
        Win @ x + A @ r + b)


def rollout_reference(r, Win, A, b, Wout, bout, leak, gamma, dt, n_steps):
    for _ in range(n_steps):
        r = r + dt * pred_reference(r, Win, A, b, Wout, bout, leak, gamma)
    return r


# ------------------------------------ test ----------------------------------

if __name__ == "__main__":
    # Small, deterministic shapes consistent with a Lorenz-96 reservoir:
    N = 256   # reservoir size
    D = 8     # Lorenz-96 system dimension (readout output dim)
    M = 8     # number of parallel state columns

    leak = 0.3
    gamma = 10.0

    key = jax.random.PRNGKey(0)
    k_r, k_win, k_a, k_b, k_wo, k_bo, k_rb = jax.random.split(key, 7)

    r    = jax.random.normal(k_r,   (N, M), dtype=jnp.float32)
    Win  = jax.random.normal(k_win, (N, D), dtype=jnp.float32) * 0.1
    A    = jax.random.normal(k_a,   (N, N), dtype=jnp.float32) * 0.05
    b    = jax.random.normal(k_b,   (N, 1), dtype=jnp.float32) * 0.1
    Wout = jax.random.normal(k_wo,  (D, N), dtype=jnp.float32) * 0.1   # readout weights
    bout = jax.random.normal(k_bo,  (D, 1), dtype=jnp.float32) * 0.1   # readout bias
    # TODO(synk): the sklearn `readout.predict` is modeled as the deterministic
    # affine map (Wout, bout); a non-linear readout has no in-kernel equivalent.

    # --- exact f32-MXU path: matches Pred.forward to tight tolerance ---------
    _, pred_f32 = make_pred(Win, A, b, Wout, bout, leak, gamma,
                            mxu_dtype=jnp.float32)
    out = jax.block_until_ready(pred_f32(r))
    ref = pred_reference(r, Win, A, b, Wout, bout, leak, gamma)
    assert out.shape == (N, M)
    assert jnp.allclose(out, ref, atol=1e-4, rtol=1e-4), "f32 single-step mismatch"

    # --- bf16-MXU, transpose-free, batched (fills MXU rows, 2-block grid) ----
    MB = 256
    rbT = jax.random.normal(k_rb, (MB, N), dtype=jnp.float32)   # (M, N) lane-dense
    pred_t_bf16, _ = make_pred(Win, A, b, Wout, bout, leak, gamma,
                               mxu_dtype=jnp.bfloat16)
    out_bT = jax.block_until_ready(pred_t_bf16(rbT))
    ref_bT = pred_reference(rbT.T, Win, A, b, Wout, bout, leak, gamma).T
    assert out_bT.shape == (MB, N)
    # bf16 operands on a 256-term contraction: deliberately looser tolerance.
    assert jnp.allclose(out_bT, ref_bT, atol=5e-3, rtol=5e-3), "bf16 batched mismatch"

    # --- weight-resident multi-step Euler integration inside one kernel ------
    dt, n_steps = 0.02, 16
    rollout_t, rollout_nm = make_rollout(Win, A, b, Wout, bout, leak, gamma,
                                         dt, n_steps, mxu_dtype=jnp.bfloat16,
                                         unroll=4)
    traj = jax.block_until_ready(rollout_nm(r))
    traj_ref = rollout_reference(r, Win, A, b, Wout, bout, leak, gamma, dt, n_steps)
    assert traj.shape == (N, M)
    assert jnp.allclose(traj, traj_ref, atol=5e-3, rtol=5e-3), "rollout mismatch"

    # transpose-free rollout path on the batched state
    traj_bT = jax.block_until_ready(rollout_t(rbT))
    traj_bref = rollout_reference(rbT.T, Win, A, b, Wout, bout, leak, gamma,
                                  dt, n_steps).T
    assert traj_bT.shape == (MB, N)
    assert jnp.allclose(traj_bT, traj_bref, atol=5e-3, rtol=5e-3), "batched rollout mismatch"

    print("KERNEL_OK")
</pallas_src>

<mosaic_0001>
module attributes {stable_mosaic.version = 11 : i64} {
  func.func @pred_kernel(%arg0: i32, %arg1: memref<8x256xf32, #tpu.memory_space<vmem>>, %arg2: memref<256x256xf32, #tpu.memory_space<vmem>>, %arg3: memref<1x256xf32, #tpu.memory_space<vmem>>, %arg4: memref<8x256xf32, #tpu.memory_space<vmem>>) attributes {dimension_semantics = [#tpu.dimension_semantics<parallel>], iteration_bounds = array<i64: 1>, scalar_prefetch = 0 : i64, scratch_operands = 0 : i64, tpu.core_type = #tpu.core_type<tc>, window_params = [{transform_indices = @transform_0, window_bounds = array<i64: 8, 256>}, {pipeline_mode = #tpu.pipeline_mode<synchronous>, transform_indices = @transform_1, window_bounds = array<i64: 256, 256>}, {pipeline_mode = #tpu.pipeline_mode<synchronous>, transform_indices = @transform_2, window_bounds = array<i64: 1, 256>}, {transform_indices = @transform_3, window_bounds = array<i64: 8, 256>}]} {
    %c0 = arith.constant 0 : index
    %c0_0 = arith.constant 0 : index
    %0 = vector.load %arg1[%c0, %c0_0] : memref<8x256xf32, #tpu.memory_space<vmem>>, vector<8x256xf32>
    %c0_1 = arith.constant 0 : index
    %c0_2 = arith.constant 0 : index
    %1 = vector.load %arg2[%c0_1, %c0_2] : memref<256x256xf32, #tpu.memory_space<vmem>>, vector<256x256xf32>
    %cst = arith.constant dense<0.000000e+00> : vector<8x256xf32>
    %2 = tpu.matmul %0, %1, %cst {dimension_numbers = #tpu.dot_dimension_numbers<[1], [0], [0], [1], [0, 0, 1, 1], [], []>} : vector<8x256xf32>, vector<256x256xf32>, vector<8x256xf32> -> vector<8x256xf32>
    %c0_3 = arith.constant 0 : index
    %c0_4 = arith.constant 0 : index
    %3 = vector.load %arg3[%c0_3, %c0_4] : memref<1x256xf32, #tpu.memory_space<vmem>>, vector<1x256xf32>
    %4 = vector.broadcast %3 : vector<1x256xf32> to vector<8x256xf32>
    %5 = arith.addf %2, %4 : vector<8x256xf32>
    %cst_5 = arith.constant -7.000000e-02 : f32
    %6 = vector.broadcast %cst_5 : f32 to vector<8x256xf32>
    %7 = arith.mulf %6, %0 : vector<8x256xf32>
    %8 = math.tanh %5 : vector<8x256xf32>
    %cst_6 = arith.constant 7.000000e-02 : f32
    %9 = vector.broadcast %cst_6 : f32 to vector<8x256xf32>
    %10 = arith.mulf %9, %8 : vector<8x256xf32>
    %11 = arith.addf %7, %10 : vector<8x256xf32>
    %c0_7 = arith.constant 0 : index
    %c0_8 = arith.constant 0 : index
    %12 = vector.load %arg4[%c0_7, %c0_8] : memref<8x256xf32, #tpu.memory_space<vmem>>, vector<8x256xf32>
    tpu.vector_store %arg4[%c0_7, %c0_8], %11 {strides = array<i32>} : memref<8x256xf32, #tpu.memory_space<vmem>>, vector<8x256xf32>,
    return
  }
  func.func @transform_0(%arg0: i32) -> (i32, i32) {
    %c0_i32 = arith.constant 0 : i32
    %c0_i32_0 = arith.constant 0 : i32
    return %arg0, %c0_i32 : i32, i32
  }
  func.func @transform_1(%arg0: i32) -> (i32, i32) {
    %c0_i32 = arith.constant 0 : i32
    %c0_i32_0 = arith.constant 0 : i32
    %c0_i32_1 = arith.constant 0 : i32
    return %c0_i32, %c0_i32_0 : i32, i32
  }
  func.func @transform_2(%arg0: i32) -> (i32, i32) {
    %c0_i32 = arith.constant 0 : i32
    %c0_i32_0 = arith.constant 0 : i32
    %c0_i32_1 = arith.constant 0 : i32
    return %c0_i32, %c0_i32_0 : i32, i32
  }
  func.func @transform_3(%arg0: i32) -> (i32, i32) {
    %c0_i32 = arith.constant 0 : i32
    %c0_i32_0 = arith.constant 0 : i32
    return %arg0, %c0_i32 : i32, i32
  }
}

</mosaic_0001>

<bundles_post_ra>
// kernel: pred_t.1
= control target key start
LH: loop header
LB: loop body
LE: loop exit
PB: predicated region body
PF: predicated region fallthrough
CT: control target
= control target key end

     0   :  { %8 = vsyncpa [#allocation3], 0  ;;  %s436_s0 = inlined_call_operand.hbm [shape: f32[8,256], index: 0, kind: input, shape index: {}]   ;;  %s437_s1 = inlined_call_operand.hbm [shape: f32[256,256], index: 1, kind: input, shape index: {}]   ;;  %s438_s2 = inlined_call_operand.vmem [shape: f32[1,256], index: 2, kind: input, shape index: {}]   ;;  %s439_s3 = inlined_call_operand.hbm [shape: f32[8,256], index: 3, kind: output, shape index: {}]  }
   0x1   :  { %9 = vsyncpa [#allocation6], 0 }
   0x2   :  { %10 = vsyncpa [#allocation4], 0  ;;  %s361_s12 = smov [#allocation2]   ;;  %s362_s14 = smov [#allocation5]  }
   0x3   :  { %s17_s13 = sshll.u32 %s361_s12, 4  ;;  %s26_s15 = sshll.u32 %s362_s14, 4  ;;  %s18_s13 = int_to_ptr.vmem [resolvable:$true] %s17_s13  ;;  %s386_s15 = int_to_ptr.vmem [resolvable:$true] %s26_s15 }
   0x4   :  { %s289_s18 = scalar_lea.hbm %s436_s0, 256 }
   0x5   :  { %p290_p0 = scmp.ne.s32.totalorder %s436_s0, %s289_s18  ;;  %p293_p1 = scmp.lt.u32.totalorder %s289_s18, %s436_s0 }
   0x7   :  { %p295_p2 = pnand %p293_p1, %p290_p0 }
   0x9   :  { %298 = shalt.err (!%p295_p2)
}
   0xa   :  { %s299_s23 = scalar_lea.vmem %s18_s13, 256  ;;  %p304_p4 = scmp.lt.s32.totalorder %s18_s13, %s18_s13 }
   0xb   :  { %p300_p3 = scmp.ne.s32.totalorder %s18_s13, %s299_s23  ;;  %p305_p5 = scmp.lt.s32.totalorder %s299_s23, %s299_s23 }
   0xd   :  { %p306_p6 = por %p305_p5, %p304_p4 }
   0xf   :  { %p307_p7 = pnand %p306_p6, %p300_p3 }
  0x11   :  { %310 = shalt.err (!%p307_p7)
}
  0x12   :  { %20 = dma.hbm_to_vmem [thread:$0]  %s436_s0, 256, %s18_s13, [#allocation3]  }
  0x13   :  { %s311_s28 = scalar_lea.hbm %s437_s1, 8192 }
  0x14   :  { %p312_p8 = scmp.ne.s32.totalorder %s437_s1, %s311_s28  ;;  %p315_p9 = scmp.lt.u32.totalorder %s311_s28, %s437_s1 }
  0x16   :  { %p317_p10 = pnand %p315_p9, %p312_p8 }
  0x18   :  { %320 = shalt.err (!%p317_p10)
}
  0x19   :  { %s321_s6 = scalar_lea.vmem %s386_s15, 8192  ;;  %p326_p12 = scmp.lt.s32.totalorder %s386_s15, %s386_s15 }
  0x1a   :  { %p322_p11 = scmp.ne.s32.totalorder %s386_s15, %s321_s6  ;;  %p327_p13 = scmp.lt.s32.totalorder %s321_s6, %s321_s6 }
  0x1c   :  { %p328_p0 = por %p327_p13, %p326_p12 }
  0x1e   :  { %p329_p1 = pnand %p328_p0, %p322_p11 }
  0x20   :  { %332 = shalt.err (!%p329_p1)
}
  0x21   :  { %s363_s0 = smov 256   ;;  %s364_s7 = smov 16  }
  0x22   :  { %32 = dma.hbm_to_vmem [thread:$0]  %s437_s1, 8192, %s386_s15, [#allocation6], %s363_s0, %s363_s0, %s364_s7  }
  0x23   :  { %355 = dma.done.wait [#allocation3], 256  }
  0x24   :  { %356 = vsyncadd [#allocation3], 4294967040 }
  0x25   :  { %357 = dma.done.wait [#allocation6], 8192  }
  0x26   :  { %358 = vsyncadd [#allocation6], 4294959104  ;;  %v44_v0 = vld [vmem:[#allocation5 + $0x8] sm:$0xff]  ;;  %v46_v1 = vld [vmem:[#allocation5 + $0x18] sm:$0xff]  ;;  %s365_s11 = smov [#allocation7]  }
  0x27   :  { %v43_v2 = vld [vmem:[#allocation5] sm:$0xff]  ;;  %v216_v3 = vpack.c.bf16 %v46_v1, %v44_v0  ;;  %v45_v4 = vld [vmem:[#allocation5 + $0x10] sm:$0xff]  ;;  %v48_v5 = vld [vmem:[#allocation5 + $0x28] sm:$0xff]  ;;  %s206_s12 = sshll.u32 %s365_s11, 4  ;;  %s207_s12 = int_to_ptr.vmem [resolvable:$true] %s206_s12 }
  0x28   :  { %v50_v6 = vld [vmem:[#allocation5 + $0x38] sm:$0xff]  ;;  %v218_v7 = vpack.c.bf16 %v45_v4, %v43_v2  ;;  %v47_v9 = vld [vmem:[#allocation5 + $0x20] sm:$0xff]  ;;  %v49_v10 = vld [vmem:[#allocation5 + $0x30] sm:$0xff]  ;;  %p338_p3 = scmp.lt.s32.totalorder %s207_s12, %s207_s12 }
  0x29   :  { %v220_v8 = vpack.c.bf16 %v50_v6, %v48_v5  ;;  %v52_v11 = vld [vmem:[#allocation5 + $0x48] sm:$0xff]  ;;  %217 = vmatprep.subr.bf16.mxu0 %v216_v3  ;;  %v54_v12 = vld [vmem:[#allocation5 + $0x58] sm:$0xff]  ;;  %v222_v13 = vpack.c.bf16 %v49_v10, %v47_v9  ;;  %v51_v15 = vld [vmem:[#allocation5 + $0x40] sm:$0xff] }
  0x2a   :  { %219 = vmatpush1.bf16.msra.mxu0 %v218_v7  ;;  %v224_v14 = vpack.c.bf16 %v54_v12, %v52_v11  ;;  %v53_v16 = vld [vmem:[#allocation5 + $0x50] sm:$0xff]  ;;  %v56_v17 = vld [vmem:[#allocation5 + $0x68] sm:$0xff]  ;;  %v58_v18 = vld [vmem:[#allocation5 + $0x78] sm:$0xff] }
  0x2b   :  { %221 = vmatprep.subr.bf16.mxu0 %v220_v8  ;;  %v226_v19 = vpack.c.bf16 %v53_v16, %v51_v15  ;;  %v228_v20 = vpack.c.bf16 %v58_v18, %v56_v17  ;;  %v55_v21 = vld [vmem:[#allocation5 + $0x60] sm:$0xff]  ;;  %v57_v22 = vld [vmem:[#allocation5 + $0x70] sm:$0xff]  ;;  %v60_v23 = vld [vmem:[#allocation5 + $0x88] sm:$0xff] }
  0x2c   :  { %v62_v24 = vld [vmem:[#allocation5 + $0x98] sm:$0xff]  ;;  %v230_v25 = vpack.c.bf16 %v57_v22, %v55_v21  ;;  %v59_v27 = vld [vmem:[#allocation5 + $0x80] sm:$0xff]  ;;  %v61_v28 = vld [vmem:[#allocation5 + $0x90] sm:$0xff] }
  0x2d   :  { %v232_v26 = vpack.c.bf16 %v62_v24, %v60_v23  ;;  %v64_v29 = vld [vmem:[#allocation5 + $0xa8] sm:$0xff]  ;;  %v66_v30 = vld [vmem:[#allocation5 + $0xb8] sm:$0xff]  ;;  %v234_v31 = vpack.c.bf16 %v61_v28, %v59_v27  ;;  %v63_v33 = vld [vmem:[#allocation5 + $0xa0] sm:$0xff] }
  0x2e   :  { %223 = vmatpush1.bf16.msra.mxu0 %v222_v13  ;;  %v236_v32 = vpack.c.bf16 %v66_v30, %v64_v29  ;;  %v65_v34 = vld [vmem:[#allocation5 + $0xb0] sm:$0xff]  ;;  %v68_v35 = vld [vmem:[#allocation5 + $0xc8] sm:$0xff]  ;;  %v70_v36 = vld [vmem:[#allocation5 + $0xd8] sm:$0xff] }
  0x2f   :  { %225 = vmatprep.subr.bf16.mxu0 %v224_v14  ;;  %v238_v37 = vpack.c.bf16 %v65_v34, %v63_v33  ;;  %v240_v38 = vpack.c.bf16 %v70_v36, %v68_v35  ;;  %v67_v39 = vld [vmem:[#allocation5 + $0xc0] sm:$0xff]  ;;  %v69_v40 = vld [vmem:[#allocation5 + $0xd0] sm:$0xff]  ;;  %v417_v41 = vld [vmem:[#allocation2 + $0x8] sm:$0xff]  ;;  %v109_v34 = vlaneseq }
  0x30   :  { %v72_v42 = vld [vmem:[#allocation5 + $0xe8] sm:$0xff]  ;;  %v74_v43 = vld [vmem:[#allocation5 + $0xf8] sm:$0xff]  ;;  %183 = vmatprep.mubr.f32.mxu0 %v417_v41  ;;  %v242_v44 = vpack.c.bf16 %v69_v40, %v67_v39  ;;  %v71_v46 = vld [vmem:[#allocation5 + $0xe0] sm:$0xff] }
  0x31   :  { %v244_v45 = vpack.c.bf16 %v74_v43, %v72_v42  ;;  %v73_v47 = vld [vmem:[#allocation5 + $0xf0] sm:$0xff]  ;;  %v76_v48 = vld [vmem:[#allocation5 + $0x108] sm:$0xff]  ;;  %v78_v49 = vld [vmem:[#allocation5 + $0x118] sm:$0xff]  ;;  %v110_v35 = vshrl.u32 %v109_v34, 7 }
  0x32   :  { %227 = vmatpush1.bf16.msra.mxu0 %v226_v19  ;;  %v246_v50 = vpack.c.bf16 %v73_v47, %v71_v46  ;;  %v248_v51 = vpack.c.bf16 %v78_v49, %v76_v48  ;;  %v75_v52 = vld [vmem:[#allocation5 + $0x100] sm:$0xff]  ;;  %v77_v53 = vld [vmem:[#allocation5 + $0x110] sm:$0xff]  ;;  %v80_v54 = vld [vmem:[#allocation5 + $0x128] sm:$0xff]  ;;  %v191_v48 = vmul.f32 -0.07, %v417_v41 }
  0x33   :  { %229 = vmatprep.subr.bf16.mxu0 %v228_v20  ;;  %v82_v55 = vld [vmem:[#allocation5 + $0x138] sm:$0xff]  ;;  %v250_v56 = vpack.c.bf16 %v77_v53, %v75_v52  ;;  %v79_v58 = vld [vmem:[#allocation5 + $0x120] sm:$0xff]  ;;  %v81_v59 = vld [vmem:[#allocation5 + $0x130] sm:$0xff]  ;;  %v111_v36 = vsub.s32 0, %v110_v35 }
  0x34   :  { %v252_v57 = vpack.c.bf16 %v82_v55, %v80_v54  ;;  %v84_v60 = vld [vmem:[#allocation5 + $0x148] sm:$0xff]  ;;  %v86_v61 = vld [vmem:[#allocation5 + $0x158] sm:$0xff]  ;;  %v254_v62 = vpack.c.bf16 %v81_v59, %v79_v58  ;;  %v83_v0 = vld [vmem:[#allocation5 + $0x140] sm:$0xff] }
  0x35   :  { %v256_v63 = vpack.c.bf16 %v86_v61, %v84_v60  ;;  %v85_v1 = vld [vmem:[#allocation5 + $0x150] sm:$0xff]  ;;  %v88_v2 = vld [vmem:[#allocation5 + $0x168] sm:$0xff]  ;;  %v90_v3 = vld [vmem:[#allocation5 + $0x178] sm:$0xff] }
  0x36   :  { %231 = vmatpush1.bf16.msra.mxu0 %v230_v25  ;;  %v258_v4 = vpack.c.bf16 %v85_v1, %v83_v0  ;;  %v260_v5 = vpack.c.bf16 %v90_v3, %v88_v2  ;;  %v87_v6 = vld [vmem:[#allocation5 + $0x160] sm:$0xff]  ;;  %v89_v7 = vld [vmem:[#allocation5 + $0x170] sm:$0xff]  ;;  %v92_v8 = vld [vmem:[#allocation5 + $0x188] sm:$0xff] }
  0x37   :  { %233 = vmatprep.subr.bf16.mxu0 %v232_v26  ;;  %v94_v9 = vld [vmem:[#allocation5 + $0x198] sm:$0xff]  ;;  %v262_v10 = vpack.c.bf16 %v89_v7, %v87_v6  ;;  %v91_v12 = vld [vmem:[#allocation5 + $0x180] sm:$0xff]  ;;  %v93_v13 = vld [vmem:[#allocation5 + $0x190] sm:$0xff] }
  0x38   :  { %v264_v11 = vpack.c.bf16 %v94_v9, %v92_v8  ;;  %v96_v14 = vld [vmem:[#allocation5 + $0x1a8] sm:$0xff]  ;;  %v98_v15 = vld [vmem:[#allocation5 + $0x1b8] sm:$0xff]  ;;  %v266_v16 = vpack.c.bf16 %v93_v13, %v91_v12  ;;  %v95_v18 = vld [vmem:[#allocation5 + $0x1a0] sm:$0xff] }
  0x39   :  { %v268_v17 = vpack.c.bf16 %v98_v15, %v96_v14  ;;  %v97_v19 = vld [vmem:[#allocation5 + $0x1b0] sm:$0xff]  ;;  %v100_v20 = vld [vmem:[#allocation5 + $0x1c8] sm:$0xff]  ;;  %v102_v21 = vld [vmem:[#allocation5 + $0x1d8] sm:$0xff] }
  0x3a   :  { %235 = vmatpush1.bf16.msra.mxu0 %v234_v31  ;;  %v270_v22 = vpack.c.bf16 %v97_v19, %v95_v18  ;;  %v272_v23 = vpack.c.bf16 %v102_v21, %v100_v20  ;;  %v99_v24 = vld [vmem:[#allocation5 + $0x1c0] sm:$0xff]  ;;  %v101_v25 = vld [vmem:[#allocation5 + $0x1d0] sm:$0xff]  ;;  %v104_v26 = vld [vmem:[#allocation5 + $0x1e8] sm:$0xff] }
  0x3b   :  { %237 = vmatprep.subr.bf16.mxu0 %v236_v32  ;;  %v106_v27 = vld [vmem:[#allocation5 + $0x1f8] sm:$0xff]  ;;  %v274_v28 = vpack.c.bf16 %v101_v25, %v99_v24  ;;  %v103_v30 = vld [vmem:[#allocation5 + $0x1e0] sm:$0xff]  ;;  %v105_v31 = vld [vmem:[#allocation5 + $0x1f0] sm:$0xff] }
  0x3c   :  { %v276_v29 = vpack.c.bf16 %v106_v27, %v104_v26  ;;  %v278_v32 = vpack.c.bf16 %v105_v31, %v103_v30  ;;  %v41_v33 = vld [vmem:[#allocation2] sm:$0xff] }
  0x3d   :  { %v190_v46 = vmul.f32 -0.07, %v41_v33 }
  0x3e   :  { %239 = vmatpush1.bf16.msra.mxu0 %v238_v37  ;;  %v107_v37 = vld [vmem:[%s438_s2] sm:$0x3]  ;;  %s333_s2 = scalar_lea.vmem %s207_s12, 256 }
  0x3f   :  { %241 = vmatprep.subr.bf16.mxu0 %v240_v38  ;;  %v115_v38 = vsub.s32 1, %v110_v35  ;;  %v112_v39 = vrot.slane %v107_v37, %v111_v36  ;;  %p334_p2 = scmp.ne.s32.totalorder %s207_s12, %s333_s2  ;;  %p339_p4 = scmp.lt.s32.totalorder %s333_s2, %s333_s2 }
  0x41   :  { %v116_v40 = vrot.slane %v107_v37, %v115_v38  ;;  %p340_p5 = por %p339_p4, %p338_p3 }
  0x42   :  { %243 = vmatpush1.bf16.msra.mxu0 %v242_v44 }
  0x43   :  { %245 = vmatprep.subr.bf16.mxu0 %v244_v45  ;;  %p341_p6 = pnand %p340_p5, %p334_p2 }
  0x46   :  { %247 = vmatpush1.bf16.msra.mxu0 %v246_v50 }
  0x47   :  { %249 = vmatprep.subr.bf16.mxu0 %v248_v51 }
  0x4a   :  { %251 = vmatpush1.bf16.msra.mxu0 %v250_v56 }
  0x4b   :  { %253 = vmatprep.subr.bf16.mxu0 %v252_v57 }
  0x4e   :  { %255 = vmatpush1.bf16.msra.mxu0 %v254_v62 }
  0x4f   :  { %257 = vmatprep.subr.bf16.mxu0 %v256_v63 }
  0x52   :  { %259 = vmatpush1.bf16.msra.mxu0 %v258_v4 }
  0x53   :  { %261 = vmatprep.subr.bf16.mxu0 %v260_v5 }
  0x56   :  { %263 = vmatpush1.bf16.msra.mxu0 %v262_v10 }
  0x57   :  { %265 = vmatprep.subr.bf16.mxu0 %v264_v11 }
  0x5a   :  { %267 = vmatpush1.bf16.msra.mxu0 %v266_v16 }
  0x5b   :  { %269 = vmatprep.subr.bf16.mxu0 %v268_v17 }
  0x5e   :  { %271 = vmatpush1.bf16.msra.mxu0 %v270_v22 }
  0x5f   :  { %273 = vmatprep.subr.bf16.mxu0 %v272_v23 }
  0x62   :  { %275 = vmatpush1.bf16.msra.mxu0 %v274_v28 }
  0x63   :  { %277 = vmatprep.subr.bf16.mxu0 %v276_v29 }
  0x66   :  { %279 = vmatpush1.bf16.msra.mxu0 %v278_v32 }
  0x69   :  { %184 = vmatmul.mubr.f32.vlgmr.msra.gmra.mrb[0].mxu0 %v41_v33 }
 0x13c   :  { %v185_v42 = vpop.f32.mrb[0].mxu0 }
 0x13d   :  { %v186_v43 = vadd.f32 %v185_v42, %v112_v39  ;;  %v187_v44 = vpop.f32.mrb[1].mxu0 }
 0x13e   :  { %v188_v45 = vadd.f32 %v187_v44, %v116_v40 }
 0x13f   :  { %285 = vtanh.f32 %v186_v43 }
 0x140   :  { %287 = vtanh.f32 %v188_v45 }
 0x149   :  { %v286_v47 = vpop.eup %285 }
 0x14a   :  { %v288_v49 = vpop.eup %287  ;;  %v194_v50 = vmul.f32 0.07, %v286_v47 }
 0x14b   :  { %v195_v51 = vmul.f32 0.07, %v288_v49 }
 0x14c   :  { %v196_v52 = vadd.f32 %v194_v50, %v190_v46 }
 0x14d   :  { %v197_v53 = vadd.f32 %v195_v51, %v191_v48 }
 0x14e   :  { %198 = vst [vmem:[#allocation7] sm:$0xff] %v196_v52 }
 0x14f   :  { %199 = vst [vmem:[#allocation7 + $0x8] sm:$0xff] %v197_v53 }
 0x150   :  { %344 = shalt.err (!%p341_p6)
}
 0x151   :  { %s345_s15 = scalar_lea.hbm %s439_s3, 256 }
 0x152   :  { %p346_p7 = scmp.ne.s32.totalorder %s439_s3, %s345_s15  ;;  %p349_p8 = scmp.lt.u32.totalorder %s345_s15, %s439_s3 }
 0x154   :  { %p351_p9 = pnand %p349_p8, %p346_p7 }
 0x156   :  { %354 = shalt.err (!%p351_p9)
}
 0x157   :  { %209 = dma.vmem_to_hbm [thread:$0]  %s207_s12, 256, %s439_s3, [#allocation4]  }
 0x158   :  { %359 = dma.done.wait [#allocation4], 256  }
 0x159   :  { %360 = vsyncadd [#allocation4], 4294967040 }
 0x15a   :  { %213 = vsyncpa [#allocation3], 1 }
 0x15b   :  { %214 = vsyncpa [#allocation6], 1 }
 0x15c   :  { %215 = vsyncpa [#allocation4], 1 }

</bundles_post_ra>
